<compile_context>
chip_gen: v5e
topology: v5e:2x2
jax: 0.10.0
libtpu: 0.0.40
codegen_flags: <defaults>
</compile_context>

<pallas_src>
import functools

import jax
import jax.numpy as jnp
from jax.experimental import pallas as pl
from jax.experimental.pallas import tpu as pltpu


# ----------------------------- Pallas kernels ------------------------------


def _ln_channels_last_kernel(x_ref, g_ref, b_ref, o_ref, *, eps):
    """Block: x (TM, C); normalize over the last (lane) dim."""
    x = x_ref[...].astype(jnp.float32)
    mu = jnp.mean(x, axis=-1, keepdims=True)
    xc = x - mu
    var = jnp.mean(xc * xc, axis=-1, keepdims=True)
    y = xc * jax.lax.rsqrt(var + eps)                      # EUP rsqrt, no divide
    g = g_ref[...].astype(jnp.float32)
    b = b_ref[...].astype(jnp.float32)
    o_ref[...] = (y * g + b).astype(o_ref.dtype)


def _ln_channels_first_kernel(x_ref, g_ref, b_ref, o_ref, *, eps):
    """Block: x (1, C, TL); normalize over the channel (sublane) dim."""
    x = x_ref[0].astype(jnp.float32)                       # (C, TL)
    mu = jnp.mean(x, axis=0, keepdims=True)                # (1, TL)
    xc = x - mu
    var = jnp.mean(xc * xc, axis=0, keepdims=True)
    y = xc * jax.lax.rsqrt(var + eps)
    g = g_ref[...].astype(jnp.float32)                     # (C, 1)
    b = b_ref[...].astype(jnp.float32)
    o_ref[0] = (y * g + b).astype(o_ref.dtype)


# ----------------------------- tiling helpers -------------------------------


def _round_up(n, m):
    return ((n + m - 1) // m) * m


_VMEM_BUDGET = 8 << 20  # per-call working-set budget (4 buffers: in/out x2)


def _row_tile(n_rows, c):
    """Largest row tile <= 1024 that fits the VMEM budget and keeps >= 2 grid
    steps (v7x megacore) when there are enough rows."""
    tm = 1024
    lane_bytes = max(c, 128) * 4
    while tm > 8 and tm * lane_bytes * 4 > _VMEM_BUDGET:
        tm //= 2
    while tm > 8 and _round_up(n_rows, tm) // tm < 2:
        tm //= 2
    return max(tm, 8)


def _lane_tile(hw, c, batch):
    """Lane tile over flattened spatial for channels_first."""
    tl = min(_round_up(hw, 128), 2048)
    while tl > 128 and c * tl * 4 * 4 > _VMEM_BUDGET:
        tl //= 2
        tl = _round_up(tl, 128)
    # keep >= 2 total grid steps across (batch, spatial-tiles) for v7x
    if batch * (_round_up(hw, tl) // tl) < 2 and tl > 128:
        tl = max(128, _round_up(pl.cdiv(hw, 2), 128))
    return tl


# ----------------------------- wrappers --------------------------------------


def layer_norm_channels_last(x, weight, bias, eps=1e-6):
    """F.layer_norm(x, (C,), weight, bias, eps) for x of shape (..., C)."""
    orig_shape = x.shape
    C = orig_shape[-1]
    x2 = x.reshape(-1, C)
    n = x2.shape[0]

    tm = _row_tile(n, C)
    n_pad = _round_up(n, tm)
    if n_pad != n:
        x2 = jnp.pad(x2, ((0, n_pad - n), (0, 0)))

    out = pl.pallas_call(
        functools.partial(_ln_channels_last_kernel, eps=eps),
        out_shape=jax.ShapeDtypeStruct((n_pad, C), x.dtype),
        grid=(n_pad // tm,),
        in_specs=[
            pl.BlockSpec((tm, C), lambda i: (i, 0)),
            pl.BlockSpec((1, C), lambda i: (0, 0)),
            pl.BlockSpec((1, C), lambda i: (0, 0)),
        ],
        out_specs=pl.BlockSpec((tm, C), lambda i: (i, 0)),
        compiler_params=pltpu.CompilerParams(dimension_semantics=("parallel",)),
    )(x2, weight.reshape(1, C), bias.reshape(1, C))
    return out[:n].reshape(orig_shape)


def layer_norm_channels_first(x, weight, bias, eps=1e-6):
    """channels_first LayerNorm for x of shape (B, C, *spatial)."""
    B, C = x.shape[0], x.shape[1]
    hw = 1
    for s in x.shape[2:]:
        hw *= s
    x3 = x.reshape(B, C, hw)

    tl = _lane_tile(hw, C, B)
    hw_pad = _round_up(hw, tl)
    if hw_pad != hw:
        x3 = jnp.pad(x3, ((0, 0), (0, 0), (0, hw_pad - hw)))

    out = pl.pallas_call(
        functools.partial(_ln_channels_first_kernel, eps=eps),
        out_shape=jax.ShapeDtypeStruct((B, C, hw_pad), x.dtype),
        grid=(B, hw_pad // tl),
        in_specs=[
            pl.BlockSpec((1, C, tl), lambda b, j: (b, 0, j)),
            pl.BlockSpec((C, 1), lambda b, j: (0, 0)),
            pl.BlockSpec((C, 1), lambda b, j: (0, 0)),
        ],
        out_specs=pl.BlockSpec((1, C, tl), lambda b, j: (b, 0, j)),
        compiler_params=pltpu.CompilerParams(
            dimension_semantics=("parallel", "parallel")),
    )(x3, weight.reshape(C, 1), bias.reshape(C, 1))
    return out[:, :, :hw].reshape(x.shape)


def layer_norm(x, weight, bias, eps=1e-6, data_format="channels_last"):
    if data_format == "channels_last":
        return layer_norm_channels_last(x, weight, bias, eps)
    elif data_format == "channels_first":
        return layer_norm_channels_first(x, weight, bias, eps)
    raise NotImplementedError(data_format)


# ------------------------------ references -----------------------------------


def _ref_channels_last(x, w, b, eps):
    mu = x.mean(-1, keepdims=True)
    var = ((x - mu) ** 2).mean(-1, keepdims=True)
    return (x - mu) / jnp.sqrt(var + eps) * w + b


def _ref_channels_first(x, w, b, eps):
    mu = x.mean(1, keepdims=True)
    var = ((x - mu) ** 2).mean(1, keepdims=True)
    y = (x - mu) / jnp.sqrt(var + eps)
    return w[:, None, None] * y + b[:, None, None]


# --------------------------------- main ---------------------------------------


if __name__ == "__main__":
    eps = 1e-6
    B, H, W, C = 2, 16, 16, 32

    key = jax.random.PRNGKey(0)
    k1, k2, k3, k4, k5 = jax.random.split(key, 5)
    weight = 1.0 + 0.1 * jax.random.normal(k3, (C,), jnp.float32)
    bias = 0.05 * jax.random.normal(k4, (C,), jnp.float32)

    ln_last = jax.jit(functools.partial(layer_norm, eps=eps,
                                        data_format="channels_last"))
    ln_first = jax.jit(functools.partial(layer_norm, eps=eps,
                                         data_format="channels_first"))

    # channels_last: (B, H, W, C), normalize over the last dim
    x_last = jax.random.normal(k1, (B, H, W, C), jnp.float32)
    y_last = jax.block_until_ready(ln_last(x_last, weight, bias))
    ref_last = _ref_channels_last(x_last, weight, bias, eps)
    assert y_last.shape == x_last.shape and y_last.dtype == x_last.dtype
    assert bool(jnp.all(jnp.isfinite(y_last)))
    assert bool(jnp.allclose(y_last, ref_last, atol=1e-5, rtol=1e-5))

    # channels_last with a row count that is not a tile multiple (pad path)
    x_odd = jax.random.normal(k5, (5, 37, C), jnp.float32)
    y_odd = jax.block_until_ready(ln_last(x_odd, weight, bias))
    ref_odd = _ref_channels_last(x_odd, weight, bias, eps)
    assert bool(jnp.allclose(y_odd, ref_odd, atol=1e-5, rtol=1e-5))

    # channels_first: (B, C, H, W), normalize over dim 1
    x_first = jax.random.normal(k2, (B, C, H, W), jnp.float32)
    y_first = jax.block_until_ready(ln_first(x_first, weight, bias))
    ref_first = _ref_channels_first(x_first, weight, bias, eps)
    assert y_first.shape == x_first.shape and y_first.dtype == x_first.dtype
    assert bool(jnp.all(jnp.isfinite(y_first)))
    assert bool(jnp.allclose(y_first, ref_first, atol=1e-5, rtol=1e-5))

    print("KERNEL_OK")
</pallas_src>

<mosaic_0001>
module attributes {stable_mosaic.version = 11 : i64} {
  func.func @_ln_channels_last_kernel(%arg0: i32, %arg1: memref<256x32xf32, #tpu.memory_space<vmem>>, %arg2: memref<1x32xf32, #tpu.memory_space<vmem>>, %arg3: memref<1x32xf32, #tpu.memory_space<vmem>>, %arg4: memref<256x32xf32, #tpu.memory_space<vmem>>) attributes {dimension_semantics = [#tpu.dimension_semantics<parallel>], iteration_bounds = array<i64: 2>, scalar_prefetch = 0 : i64, scratch_operands = 0 : i64, tpu.core_type = #tpu.core_type<tc>, window_params = [{transform_indices = @transform_0, window_bounds = array<i64: 256, 32>}, {pipeline_mode = #tpu.pipeline_mode<synchronous>, transform_indices = @transform_1, window_bounds = array<i64: 1, 32>}, {pipeline_mode = #tpu.pipeline_mode<synchronous>, transform_indices = @transform_2, window_bounds = array<i64: 1, 32>}, {transform_indices = @transform_3, window_bounds = array<i64: 256, 32>}]} {
    %c0 = arith.constant 0 : index
    %c0_0 = arith.constant 0 : index
    %0 = vector.load %arg1[%c0, %c0_0] : memref<256x32xf32, #tpu.memory_space<vmem>>, vector<256x32xf32>
    %cst = arith.constant dense<0.000000e+00> : vector<256xf32>
    %1 = vector.multi_reduction <add>, %0, %cst [1] : vector<256x32xf32> to vector<256xf32>
    %2 = vector.shape_cast %1 : vector<256xf32> to vector<256x1xf32>
    %cst_1 = arith.constant 3.200000e+01 : f32
    %3 = vector.broadcast %cst_1 : f32 to vector<256x1xf32>
    %4 = arith.divf %2, %3 : vector<256x1xf32>
    %5 = vector.broadcast %4 : vector<256x1xf32> to vector<256x32xf32>
    %6 = arith.subf %0, %5 : vector<256x32xf32>
    %7 = arith.mulf %6, %6 : vector<256x32xf32>
    %cst_2 = arith.constant dense<0.000000e+00> : vector<256xf32>
    %8 = vector.multi_reduction <add>, %7, %cst_2 [1] : vector<256x32xf32> to vector<256xf32>
    %9 = vector.shape_cast %8 : vector<256xf32> to vector<256x1xf32>
    %cst_3 = arith.constant 3.200000e+01 : f32
    %10 = vector.broadcast %cst_3 : f32 to vector<256x1xf32>
    %11 = arith.divf %9, %10 : vector<256x1xf32>
    %cst_4 = arith.constant 9.99999997E-7 : f32
    %12 = vector.broadcast %cst_4 : f32 to vector<256x1xf32>
    %13 = arith.addf %11, %12 : vector<256x1xf32>
    %14 = math.rsqrt %13 : vector<256x1xf32>
    %15 = vector.broadcast %14 : vector<256x1xf32> to vector<256x32xf32>
    %16 = arith.mulf %6, %15 : vector<256x32xf32>
    %c0_5 = arith.constant 0 : index
    %c0_6 = arith.constant 0 : index
    %17 = vector.load %arg2[%c0_5, %c0_6] : memref<1x32xf32, #tpu.memory_space<vmem>>, vector<1x32xf32>
    %c0_7 = arith.constant 0 : index
    %c0_8 = arith.constant 0 : index
    %18 = vector.load %arg3[%c0_7, %c0_8] : memref<1x32xf32, #tpu.memory_space<vmem>>, vector<1x32xf32>
    %19 = vector.broadcast %17 : vector<1x32xf32> to vector<256x32xf32>
    %20 = arith.mulf %16, %19 : vector<256x32xf32>
    %21 = vector.broadcast %18 : vector<1x32xf32> to vector<256x32xf32>
    %22 = arith.addf %20, %21 : vector<256x32xf32>
    %c0_9 = arith.constant 0 : index
    %c0_10 = arith.constant 0 : index
    %23 = vector.load %arg4[%c0_9, %c0_10] : memref<256x32xf32, #tpu.memory_space<vmem>>, vector<256x32xf32>
    tpu.vector_store %arg4[%c0_9, %c0_10], %22 {strides = array<i32>} : memref<256x32xf32, #tpu.memory_space<vmem>>, vector<256x32xf32>,
    return
  }
  func.func @transform_0(%arg0: i32) -> (i32, i32) {
    %c0_i32 = arith.constant 0 : i32
    %c0_i32_0 = arith.constant 0 : i32
    return %arg0, %c0_i32 : i32, i32
  }
  func.func @transform_1(%arg0: i32) -> (i32, i32) {
    %c0_i32 = arith.constant 0 : i32
    %c0_i32_0 = arith.constant 0 : i32
    %c0_i32_1 = arith.constant 0 : i32
    return %c0_i32, %c0_i32_0 : i32, i32
  }
  func.func @transform_2(%arg0: i32) -> (i32, i32) {
    %c0_i32 = arith.constant 0 : i32
    %c0_i32_0 = arith.constant 0 : i32
    %c0_i32_1 = arith.constant 0 : i32
    return %c0_i32, %c0_i32_0 : i32, i32
  }
  func.func @transform_3(%arg0: i32) -> (i32, i32) {
    %c0_i32 = arith.constant 0 : i32
    %c0_i32_0 = arith.constant 0 : i32
    return %arg0, %c0_i32 : i32, i32
  }
}

</mosaic_0001>

<bundles_post_ra>
// kernel: layer_norm.1
= control target key start
LH: loop header
LB: loop body
LE: loop exit
PB: predicated region body
PF: predicated region fallthrough
CT: control target
= control target key end

     0   :  { %8 = vsyncpa [#allocation3], 0  ;;  %s2577_s0 = inlined_call_operand.hbm [shape: f32[512,32], index: 0, kind: input, shape index: {}]   ;;  %s2578_s1 = inlined_call_operand.vmem [shape: f32[1,32], index: 1, kind: input, shape index: {}]   ;;  %s2579_s2 = inlined_call_operand.vmem [shape: f32[1,32], index: 2, kind: input, shape index: {}]   ;;  %s2580_s3 = inlined_call_operand.hbm [shape: f32[512,32], index: 3, kind: output, shape index: {}]  }
   0x1   :  { %10 = vsyncpa [#allocation3 + $0x1], 0 }
   0x2   :  { %11 = vsyncpa [#allocation4], 0 }
   0x3   :  { %13 = vsyncpa [#allocation4 + $0x1], 0  ;;  %s1390_s12 = smov 0   ;;  %s1392_s13 = smov 0  }
   0x4   :  { %s1394_s14 = smov 0   ;;  %s1396_s15 = smov 0  }
   0x5 LB: > { %s1411_s16 = sadd.s32 4294967295, %s1363_s15   ;;  %s1130_s17 = sadd.s32 4294967294, %s1363_s15   ;;  %s1363_s15 = sphi %s1396_s15, %s2610_s15   ;;  %s1359_s14 = sphi %s1394_s14, %s2609_s14   ;;  %s1355_s13 = sphi %s1392_s13, %s2608_s13   ;;  %s1351_s12 = sphi %s1390_s12, %s2607_s12  }
   0x6   : > { %s1415_s18 = sadd.s32 1, %s1363_s15   ;;  %s26_s19 = sadd.s32 1, %s1359_s14 }
   0x7   : > { %s23_s20 = ssub.s32 %s1363_s15, %s1415_s18  ;;  %p33_p0 = scmp.ne.s32.totalorder %s1359_s14, %s1355_s13 }
   0x8   : > { %p24_p1 = scmp.eq.s32.totalorder %s23_s20, 0  ;;  %p34_p2 = scmp.eq.s32.totalorder %s1363_s15, 0 }
   0x9   : > { %p39_p3 = scmp.ne.s32.totalorder %s1355_s13, %s1351_s12  ;;  %p40_p4 = scmp.eq.s32.totalorder %s1411_s16, 0 }
   0xa   : > { %s1427_s21 = scalar_select %p24_p1, %s1359_s14, %s26_s19  }
   0xb   : > { %p1429_p5 = por %p34_p2, %p33_p0  ;;  %p1433_p6 = por %p40_p4, %p39_p3 }
   0xc   : > { %p105_p7 = scmp.eq.s32.totalorder %s1411_s16, 1  ;;  %p111_p8 = scmp.eq.s32.totalorder %s1130_s17, 1 }
   0xd   : > { %p1158_p10 = scmp.lt.s32.totalorder %s1363_s15, 2  ;;  %s137_s26 = sand.u32 1, %s1359_s14  }
   0xe   : > { %p1440_p11 = por %p105_p7, %p33_p0  ;;  %p1444_p12 = por %p111_p8, %p39_p3 }
   0xf   : > { %s1144_s27 = sshll.u32 %s1363_s15, 8  ;;  %s1133_s28 = sshll.u32 %s137_s26, 8 }
  0x10   : > { %s146_s4 = scalar_lea.hbm %s2577_s0, %s1144_s27  ;;  %s141_s6 = scalar_lea.vmem [#allocation2], %s1133_s28 }
  0x11   : > { %s147_s5 = sshll.u32 %s146_s4, 4  ;;  %s149_s7 = sshll.u32 %s141_s6, 4  ;;  %s148_s5 = int_to_ptr.hbm [resolvable:$true] %s147_s5  ;;  %s150_s7 = int_to_ptr.vmem [resolvable:$true] %s149_s7 }
  0x12   : > { %p1455_p13 = pnand %p1158_p10, %p1429_p5  ;;  %p1136_p0 = scmp.ge.s32.totalorder %s1363_s15, 1 }
  0x13   : > { %p157_p1 = scmp.lt.s32.totalorder %s1363_s15, 3  ;;  %s138_s9 = scalar_lea.sflag [#allocation3], %s137_s26 }
  0x14   : > { %s1267_s10 = sshra.s32 %s148_s5, 4  ;;  %p1271_p3 = pneg %p1455_p13  ;;  %s1268_s10 = int_to_ptr.hbm [resolvable:$true] %s1267_s10 }
  0x15   : > { %s1269_s11 = scalar_lea.hbm %s1268_s10, 256  ;;  %s1274_s20 = scalar_lea.hbm %s2577_s0, 512 }
  0x16   : > { %p1270_p2 = scmp.ne.s32.totalorder %s1268_s10, %s1269_s11  ;;  %p1275_p5 = scmp.lt.s32.totalorder %s1268_s10, %s2577_s0 }
  0x17   : > { %p1276_p8 = scmp.lt.s32.totalorder %s1274_s20, %s1269_s11 }
  0x18   : > { %p1272_p4 = pnand %p1271_p3, %p1270_p2 }
  0x19   : > { %p1277_p10 = por %p1276_p8, %p1275_p5 }
  0x1a   : > { %p1273_p7 = pneg %p1272_p4 }
  0x1c   : > { %p1278_p9 = pnand %p1277_p10, %p1273_p7 }
  0x1e   : > { %1281 = shalt.err (!%p1278_p9)
}
  0x1f   : > { %s1365_s26 = smov 128   ;;  %s1366_s28 = smov 8  }
  0x20   : > { %1153 = dma.hbm_to_vmem [thread:$0]  (!%p1455_p13), %s148_s5, 4096, %s150_s7, %s138_s9, %s1365_s26, %s1365_s26, %s1366_s28  }
  0x21   : > { %p158_p2 = pnand %p1136_p0, %p157_p1 }
  0x22   : > { %s1476_s29 = sand.u32 (!%p158_p2), 1, %s1355_s13  }
  0x23   : > { %161 = sbr.rel (%p158_p2) target bundleno = 418 (0x1a2), region = 32  ;;  %s1137_s30 = sshll.u32 (!%p158_p2), %s1476_s29, 8 }
  0x24   : > { %s164_s4 = scalar_lea.sflag (!%p158_p2), [#allocation3], %s1476_s29  ;;  %s1482_s6 = scalar_lea.vmem (!%p158_p2), [#allocation2], %s1137_s30 }
  0x28   : > { %1342 = dma.done.wait (%p1433_p6), %s164_s4, 4096  }
  0x29   : > { %1344 = vsyncadd (%p1433_p6), %s164_s4, 4294963200  ;;  %vm225_vm0 = vcmask 261120   ;;  %v1489_v0 = vld [vmem:[%s1482_s6 + $0x20] sm:$0xff]  ;;  %v1492_v1 = vld [vmem:[%s1482_s6 + $0x10] sm:$0xff]  ;;  %s1957_s9 = scalar_lea.vmem [#allocation5], %s1137_s30  ;;  %s1145_s10 = sshll.u32 %s1411_s16, 8 }
  0x2a   : > { %v1495_v2 = vld [vmem:[%s1482_s6] sm:$0xff]  ;;  %v238_v3 = vsel %vm225_vm0, %v1489_v0, 0.0  ;;  %v232_v4 = vsel %vm225_vm0, %v1492_v1, 0.0  ;;  %v1504_v6 = vld [vmem:[%s1482_s6 + $0x28] sm:$0xff]  ;;  %v1507_v7 = vld [vmem:[%s1482_s6 + $0x18] sm:$0xff]  ;;  %s1053_s20 = scalar_lea.hbm %s2580_s3, %s1145_s10  ;;  %s1054_s22 = sshll.u32 %s1957_s9, 4  ;;  %s1055_s22 = int_to_ptr.vmem [resolvable:$true] %s1054_s22 }
  0x2b   : > { %v226_v5 = vsel %vm225_vm0, %v1495_v2, 0.0  ;;  %239 = vadd.xlane.f32.xlu2 %v238_v3  ;;  %233 = vadd.xlane.f32.xlu1 %v232_v4  ;;  %v1510_v8 = vld [vmem:[%s1482_s6 + $0x8] sm:$0xff]  ;;  %v241_v9 = vsel %vm225_vm0, %v1504_v6, 0.0  ;;  %v235_v10 = vsel %vm225_vm0, %v1507_v7, 0.0  ;;  %v1519_v12 = vld [vmem:[%s1482_s6 + $0x40] sm:$0xff]  ;;  %v1522_v13 = vld [vmem:[%s1482_s6 + $0x38] sm:$0xff] }
  0x2c   : > { %227 = vadd.xlane.f32.xlu0 %v226_v5  ;;  %v229_v11 = vsel %vm225_vm0, %v1510_v8, 0.0  ;;  %v1525_v14 = vld [vmem:[%s1482_s6 + $0x30] sm:$0xff]  ;;  %v250_v15 = vsel %vm225_vm0, %v1519_v12, 0.0  ;;  %v247_v16 = vsel %vm225_vm0, %v1522_v13, 0.0  ;;  %v1534_v18 = vld [vmem:[%s1482_s6 + $0x58] sm:$0xff]  ;;  %v1540_v20 = vld [vmem:[%s1482_s6 + $0x48] sm:$0xff] }
  0x2d   : > { %v244_v17 = vsel %vm225_vm0, %v1525_v14, 0.0  ;;  %v1537_v19 = vld [vmem:[%s1482_s6 + $0x50] sm:$0xff]  ;;  %v259_v21 = vsel %vm225_vm0, %v1534_v18, 0.0  ;;  %v253_v23 = vsel %vm225_vm0, %v1540_v20, 0.0  ;;  %v1552_v25 = vld [vmem:[%s1482_s6 + $0x68] sm:$0xff]  ;;  %v1555_v26 = vld [vmem:[%s1482_s6 + $0x60] sm:$0xff] }
  0x2e   : > { %v256_v22 = vsel %vm225_vm0, %v1537_v19, 0.0  ;;  %v1549_v24 = vld [vmem:[%s1482_s6 + $0x70] sm:$0xff]  ;;  %v265_v28 = vsel %vm225_vm0, %v1552_v25, 0.0  ;;  %v262_v29 = vsel %vm225_vm0, %v1555_v26, 0.0  ;;  %v1564_v30 = vld [vmem:[%s1482_s6 + $0x88] sm:$0xff]  ;;  %v1567_v31 = vld [vmem:[%s1482_s6 + $0x80] sm:$0xff] }
  0x2f   : > { %v268_v27 = vsel %vm225_vm0, %v1549_v24, 0.0  ;;  %v1570_v32 = vld [vmem:[%s1482_s6 + $0x78] sm:$0xff]  ;;  %v277_v33 = vsel %vm225_vm0, %v1564_v30, 0.0  ;;  %v274_v34 = vsel %vm225_vm0, %v1567_v31, 0.0  ;;  %v1579_v36 = vld [vmem:[%s1482_s6 + $0xa0] sm:$0xff]  ;;  %v1585_v38 = vld [vmem:[%s1482_s6 + $0x90] sm:$0xff] }
  0x30   : > { %v271_v35 = vsel %vm225_vm0, %v1570_v32, 0.0  ;;  %v1582_v37 = vld [vmem:[%s1482_s6 + $0x98] sm:$0xff]  ;;  %v286_v39 = vsel %vm225_vm0, %v1579_v36, 0.0  ;;  %v280_v41 = vsel %vm225_vm0, %v1585_v38, 0.0  ;;  %v1597_v43 = vld [vmem:[%s1482_s6 + $0xb0] sm:$0xff]  ;;  %v1600_v44 = vld [vmem:[%s1482_s6 + $0xa8] sm:$0xff] }
  0x31   : > { %v283_v40 = vsel %vm225_vm0, %v1582_v37, 0.0  ;;  %v1594_v42 = vld [vmem:[%s1482_s6 + $0xb8] sm:$0xff]  ;;  %v292_v46 = vsel %vm225_vm0, %v1597_v43, 0.0  ;;  %v289_v47 = vsel %vm225_vm0, %v1600_v44, 0.0  ;;  %v1609_v48 = vld [vmem:[%s1482_s6 + $0xd0] sm:$0xff]  ;;  %v1612_v49 = vld [vmem:[%s1482_s6 + $0xc8] sm:$0xff] }
  0x32   : > { %v295_v45 = vsel %vm225_vm0, %v1594_v42, 0.0  ;;  %v1615_v50 = vld [vmem:[%s1482_s6 + $0xc0] sm:$0xff]  ;;  %v304_v51 = vsel %vm225_vm0, %v1609_v48, 0.0  ;;  %v301_v52 = vsel %vm225_vm0, %v1612_v49, 0.0  ;;  %v1624_v54 = vld [vmem:[%s1482_s6 + $0xe8] sm:$0xff]  ;;  %v1630_v56 = vld [vmem:[%s1482_s6 + $0xd8] sm:$0xff] }
  0x33   : > { %242 = vadd.xlane.f32.xlu2 %v241_v9  ;;  %236 = vadd.xlane.f32.xlu1 %v235_v10  ;;  %v298_v53 = vsel %vm225_vm0, %v1615_v50, 0.0  ;;  %v1627_v55 = vld [vmem:[%s1482_s6 + $0xe0] sm:$0xff]  ;;  %v313_v57 = vsel %vm225_vm0, %v1624_v54, 0.0  ;;  %v307_v59 = vsel %vm225_vm0, %v1630_v56, 0.0  ;;  %v1639_v60 = vld [vmem:[%s1482_s6 + $0xf8] sm:$0xff]  ;;  %v1642_v61 = vld [vmem:[%s1482_s6 + $0xf0] sm:$0xff] }
  0x34   : > { %230 = vadd.xlane.f32.xlu0 %v229_v11  ;;  %v310_v58 = vsel %vm225_vm0, %v1627_v55, 0.0  ;;  %v319_v62 = vsel %vm225_vm0, %v1639_v60, 0.0  ;;  %v316_v63 = vsel %vm225_vm0, %v1642_v61, 0.0  ;;  %v1367_v3 = vmov 32.0   ;;  %s1056_s27 = sshll.u32 %s1053_s20, 4  ;;  %s1042_s30 = scalar_lea.sflag [#allocation4], %s1476_s29  ;;  %s1057_s27 = int_to_ptr.hbm [resolvable:$true] %s1056_s27 }
  0x35   : > { %1199 = vrcp.f32 %v1367_v3  ;;  %s1311_s4 = sshra.s32 %s1057_s27, 4  ;;  %s1317_s7 = scalar_lea.hbm %s2580_s3, 512  ;;  %s1312_s4 = int_to_ptr.hbm [resolvable:$true] %s1311_s4 }
  0x36   : > { %s1313_s6 = scalar_lea.hbm %s1312_s4, 256  ;;  %p1318_p0 = scmp.lt.s32.totalorder %s1312_s4, %s2580_s3 }
  0x37   : > { %p1314_p6 = scmp.ne.s32.totalorder %s1312_s4, %s1313_s6  ;;  %p1319_p1 = scmp.lt.s32.totalorder %s1317_s7, %s1313_s6 }
  0x39   : > { %p1315_p9 = pnand %p1314_p6, %p1440_p11  ;;  %p1320_p3 = por %p1319_p1, %p1318_p0 }
  0x3b   : > { %251 = vadd.xlane.f32.xlu2 %v250_v15  ;;  %248 = vadd.xlane.f32.xlu1 %v247_v16  ;;  %v1200_v4 = vpop.eup %1199  ;;  %p1316_p13 = pneg %p1315_p9 }
  0x3c   : > { %245 = vadd.xlane.f32.xlu0 %v244_v17  ;;  %v323_v5 = vmul.f32 32.0, %v1200_v4  ;;  %vm327_vm1 = vweird.f32 %v1200_v4 }
  0x3d   : > { %p1321_p4 = pnand %p1320_p3, %p1316_p13 }
  0x3e   : > { %v324_v9 = vsub.f32 1.0, %v323_v5 }
  0x40   : > { %v325_v10 = vmul.f32 %v1200_v4, %v324_v9 }
  0x42   : > { %v326_v11 = vadd.f32 %v1200_v4, %v325_v10 }
  0x43   : > { %260 = vadd.xlane.f32.xlu2 %v259_v21  ;;  %257 = vadd.xlane.f32.xlu1 %v256_v22 }
  0x44   : > { %254 = vadd.xlane.f32.xlu0 %v253_v23  ;;  %v1648_v15 = vsel %vm327_vm1, %v1200_v4, %v326_v11 }
  0x4b   : > { %269 = vadd.xlane.f32.xlu2 %v268_v27  ;;  %266 = vadd.xlane.f32.xlu1 %v265_v28 }
  0x4c   : > { %263 = vadd.xlane.f32.xlu0 %v262_v29 }
  0x53   : > { %278 = vadd.xlane.f32.xlu2 %v277_v33  ;;  %275 = vadd.xlane.f32.xlu1 %v274_v34 }
  0x54   : > { %272 = vadd.xlane.f32.xlu0 %v271_v35 }
  0x5b   : > { %287 = vadd.xlane.f32.xlu2 %v286_v39  ;;  %284 = vadd.xlane.f32.xlu1 %v283_v40 }
  0x5c   : > { %281 = vadd.xlane.f32.xlu0 %v280_v41 }
  0x63   : > { %296 = vadd.xlane.f32.xlu2 %v295_v45  ;;  %293 = vadd.xlane.f32.xlu1 %v292_v46 }
  0x64   : > { %290 = vadd.xlane.f32.xlu0 %v289_v47 }
  0x6b   : > { %305 = vadd.xlane.f32.xlu2 %v304_v51  ;;  %302 = vadd.xlane.f32.xlu1 %v301_v52 }
  0x6c   : > { %299 = vadd.xlane.f32.xlu0 %v298_v53 }
  0x73   : > { %314 = vadd.xlane.f32.xlu2 %v313_v57  ;;  %311 = vadd.xlane.f32.xlu1 %v310_v58 }
  0x74   : > { %308 = vadd.xlane.f32.xlu0 %v307_v59 }
  0x7b   : > { %320 = vadd.xlane.f32.xlu1 %v319_v62 }
  0x7c   : > { %317 = vadd.xlane.f32.xlu0 %v316_v63 }
  0x9e   : > { %v240_v16 = vpop.xlane.xlu2 %239  ;;  %v234_v17 = vpop.xlane.xlu1 %233 }
  0x9f   : > { %v331_v21 = vmul.f32 %v1648_v15, %v234_v17  ;;  %v228_v22 = vpop.xlane.xlu0 %227  ;;  %v333_v45 = vmul.f32 %v1648_v15, %v240_v16 }
  0xa0   : > { %v329_v23 = vmul.f32 %v1648_v15, %v228_v22 }
  0xa1   : > { %v1653_v27 = vsub.f32 %v1492_v1, %v331_v21  ;;  %v1682_v58 = vsub.f32 %v1489_v0, %v333_v45 }
  0xa2   : > { %v1656_v28 = vsub.f32 %v1495_v2, %v329_v23 }
  0xa3   : > { %v395_v29 = vmul.f32 %v1653_v27, %v1653_v27  ;;  %v397_v9 = vmul.f32 %v1682_v58, %v1682_v58 }
  0xa4   : > { %v393_v33 = vmul.f32 %v1656_v28, %v1656_v28 }
  0xa5   : > { %v431_v34 = vsel %vm225_vm0, %v395_v29, 0.0  ;;  %v437_v21 = vsel %vm225_vm0, %v397_v9, 0.0 }
  0xa6   : > { %v243_v35 = vpop.xlane.xlu2 %242  ;;  %432 = vadd.xlane.f32.xlu1 %v431_v34  ;;  %v237_v39 = vpop.xlane.xlu1 %236  ;;  %v425_v40 = vsel %vm225_vm0, %v393_v33, 0.0 }
  0xa7   : > { %v334_v41 = vmul.f32 %v1648_v15, %v243_v35  ;;  %v332_v1 = vmul.f32 %v1648_v15, %v237_v39  ;;  %426 = vadd.xlane.f32.xlu2 %v425_v40  ;;  %v231_v2 = vpop.xlane.xlu0 %230 }
  0xa8   : > { %v330_v46 = vmul.f32 %v1648_v15, %v231_v2 }
  0xa9   : > { %v1669_v47 = vsub.f32 %v1504_v6, %v334_v41  ;;  %v1672_v51 = vsub.f32 %v1507_v7, %v332_v1 }
  0xaa   : > { %v1675_v52 = vsub.f32 %v1510_v8, %v330_v46 }
  0xab   : > { %v398_v53 = vmul.f32 %v1669_v47, %v1669_v47  ;;  %v396_v57 = vmul.f32 %v1672_v51, %v1672_v51 }
  0xac   : > { %v394_v59 = vmul.f32 %v1675_v52, %v1675_v52 }
  0xad   : > { %v440_v6 = vsel %vm225_vm0, %v398_v53, 0.0  ;;  %v434_v7 = vsel %vm225_vm0, %v396_v57, 0.0 }
  0xae   : > { %v252_v62 = vpop.xlane.xlu2 %251  ;;  %441 = vadd.xlane.f32.xlu1 %v440_v6  ;;  %v428_v8 = vsel %vm225_vm0, %v394_v59, 0.0  ;;  %v249_v63 = vpop.xlane.xlu1 %248 }
  0xaf   : > { %v337_v3 = vmul.f32 %v1648_v15, %v252_v62  ;;  %435 = vadd.xlane.f32.xlu2 %v434_v7  ;;  %429 = vadd.xlane.f32.xlu0 %v428_v8  ;;  %v246_v4 = vpop.xlane.xlu0 %245  ;;  %v336_v5 = vmul.f32 %v1648_v15, %v249_v63 }
  0xb0   : > { %v335_v0 = vmul.f32 %v1648_v15, %v246_v4 }
  0xb1   : > { %v1695_v10 = vsub.f32 %v1519_v12, %v337_v3  ;;  %v1703_v17 = vsub.f32 %v1522_v13, %v336_v5 }
  0xb2   : > { %v1698_v11 = vsub.f32 %v1525_v14, %v335_v0 }
  0xb3   : > { %v401_v16 = vmul.f32 %v1695_v10, %v1695_v10  ;;  %v400_v39 = vmul.f32 %v1703_v17, %v1703_v17 }
  0xb4   : > { %v399_v22 = vmul.f32 %v1698_v11, %v1698_v11 }
  0xb5   : > { %v449_v23 = vsel %vm225_vm0, %v401_v16, 0.0  ;;  %v446_v45 = vsel %vm225_vm0, %v400_v39, 0.0 }
  0xb6   : > { %v261_v29 = vpop.xlane.xlu2 %260  ;;  %450 = vadd.xlane.f32.xlu1 %v449_v23  ;;  %v443_v12 = vsel %vm225_vm0, %v399_v22, 0.0  ;;  %v258_v33 = vpop.xlane.xlu1 %257 }
  0xb7   : > { %v340_v14 = vmul.f32 %v1648_v15, %v261_v29  ;;  %438 = vadd.xlane.f32.xlu0 %v437_v21  ;;  %444 = vadd.xlane.f32.xlu2 %v443_v12  ;;  %v255_v34 = vpop.xlane.xlu0 %254  ;;  %v339_v35 = vmul.f32 %v1648_v15, %v258_v33 }
  0xb8   : > { %v338_v13 = vmul.f32 %v1648_v15, %v255_v34 }
  0xb9   : > { %v1716_v40 = vsub.f32 %v1534_v18, %v340_v14  ;;  %v1724_v2 = vsub.f32 %v1537_v19, %v339_v35 }
  0xba   : > { %v1719_v41 = vsub.f32 %v1540_v20, %v338_v13 }
  0xbb   : > { %v404_v1 = vmul.f32 %v1716_v40, %v1716_v40  ;;  %v403_v62 = vmul.f32 %v1724_v2, %v1724_v2 }
  0xbc   : > { %v402_v46 = vmul.f32 %v1719_v41, %v1719_v41 }
  0xbd   : > { %v458_v53 = vsel %vm225_vm0, %v404_v1, 0.0  ;;  %v455_v0 = vsel %vm225_vm0, %v403_v62, 0.0 }
  0xbe   : > { %v270_v57 = vpop.xlane.xlu2 %269  ;;  %459 = vadd.xlane.f32.xlu1 %v458_v53  ;;  %v452_v18 = vsel %vm225_vm0, %v402_v46, 0.0  ;;  %v267_v59 = vpop.xlane.xlu1 %266 }
  0xbf   : > { %v343_v20 = vmul.f32 %v1648_v15, %v270_v57  ;;  %447 = vadd.xlane.f32.xlu0 %v446_v45  ;;  %453 = vadd.xlane.f32.xlu2 %v452_v18  ;;  %v264_v6 = vpop.xlane.xlu0 %263  ;;  %v342_v7 = vmul.f32 %v1648_v15, %v267_v59 }
  0xc0   : > { %v341_v19 = vmul.f32 %v1648_v15, %v264_v6 }
  0xc1   : > { %v1737_v8 = vsub.f32 %v1549_v24, %v343_v20  ;;  %v1745_v4 = vsub.f32 %v1552_v25, %v342_v7 }
  0xc2   : > { %v1740_v63 = vsub.f32 %v1555_v26, %v341_v19 }
  0xc3   : > { %v407_v3 = vmul.f32 %v1737_v8, %v1737_v8  ;;  %v406_v29 = vmul.f32 %v1745_v4, %v1745_v4 }
  0xc4   : > { %v405_v5 = vmul.f32 %v1740_v63, %v1740_v63 }
  0xc5   : > { %v467_v9 = vsel %vm225_vm0, %v407_v3, 0.0  ;;  %v464_v13 = vsel %vm225_vm0, %v406_v29, 0.0 }
  0xc6   : > { %v279_v16 = vpop.xlane.xlu2 %278  ;;  %468 = vadd.xlane.f32.xlu1 %v467_v9  ;;  %v461_v24 = vsel %vm225_vm0, %v405_v5, 0.0  ;;  %v276_v21 = vpop.xlane.xlu1 %275 }
  0xc7   : > { %v346_v26 = vmul.f32 %v1648_v15, %v279_v16  ;;  %456 = vadd.xlane.f32.xlu0 %v455_v0  ;;  %462 = vadd.xlane.f32.xlu2 %v461_v24  ;;  %v273_v22 = vpop.xlane.xlu0 %272  ;;  %v345_v23 = vmul.f32 %v1648_v15, %v276_v21 }
  0xc8   : > { %v344_v25 = vmul.f32 %v1648_v15, %v273_v22 }
  0xc9   : > { %v1758_v12 = vsub.f32 %v1564_v30, %v346_v26  ;;  %v1766_v34 = vsub.f32 %v1567_v31, %v345_v23 }
  0xca   : > { %v1761_v33 = vsub.f32 %v1570_v32, %v344_v25 }
  0xcb   : > { %v410_v14 = vmul.f32 %v1758_v12, %v1758_v12  ;;  %v409_v57 = vmul.f32 %v1766_v34, %v1766_v34 }
  0xcc   : > { %v408_v35 = vmul.f32 %v1761_v33, %v1761_v33 }
  0xcd   : > { %v476_v39 = vsel %vm225_vm0, %v410_v14, 0.0  ;;  %v473_v19 = vsel %vm225_vm0, %v409_v57, 0.0 }
  0xce   : > { %v288_v1 = vpop.xlane.xlu2 %287  ;;  %477 = vadd.xlane.f32.xlu1 %v476_v39  ;;  %v470_v30 = vsel %vm225_vm0, %v408_v35, 0.0  ;;  %v285_v45 = vpop.xlane.xlu1 %284 }
  0xcf   : > { %v349_v32 = vmul.f32 %v1648_v15, %v288_v1  ;;  %465 = vadd.xlane.f32.xlu0 %v464_v13  ;;  %471 = vadd.xlane.f32.xlu2 %v470_v30  ;;  %v282_v46 = vpop.xlane.xlu0 %281  ;;  %v348_v53 = vmul.f32 %v1648_v15, %v285_v45 }
  0xd0   : > { %v347_v31 = vmul.f32 %v1648_v15, %v282_v46 }
  0xd1   : > { %v1779_v18 = vsub.f32 %v1579_v36, %v349_v32  ;;  %v1787_v6 = vsub.f32 %v1582_v37, %v348_v53 }
  0xd2   : > { %v1782_v59 = vsub.f32 %v1585_v38, %v347_v31 }
  0xd3   : > { %v413_v20 = vmul.f32 %v1779_v18, %v1779_v18  ;;  %v412_v16 = vmul.f32 %v1787_v6, %v1787_v6 }
  0xd4   : > { %v411_v7 = vmul.f32 %v1782_v59, %v1782_v59 }
  0xd5   : > { %v485_v62 = vsel %vm225_vm0, %v413_v20, 0.0  ;;  %v482_v25 = vsel %vm225_vm0, %v412_v16, 0.0 }
  0xd6   : > { %v297_v3 = vpop.xlane.xlu2 %296  ;;  %486 = vadd.xlane.f32.xlu1 %v485_v62  ;;  %v479_v36 = vsel %vm225_vm0, %v411_v7, 0.0  ;;  %v294_v0 = vpop.xlane.xlu1 %293 }
  0xd7   : > { %v352_v38 = vmul.f32 %v1648_v15, %v297_v3  ;;  %474 = vadd.xlane.f32.xlu0 %v473_v19  ;;  %480 = vadd.xlane.f32.xlu2 %v479_v36  ;;  %v291_v5 = vpop.xlane.xlu0 %290  ;;  %v351_v9 = vmul.f32 %v1648_v15, %v294_v0 }
  0xd8   : > { %v350_v37 = vmul.f32 %v1648_v15, %v291_v5 }
  0xd9   : > { %v1800_v24 = vsub.f32 %v1594_v42, %v352_v38  ;;  %v1808_v22 = vsub.f32 %v1597_v43, %v351_v9 }
  0xda   : > { %v1803_v21 = vsub.f32 %v1600_v44, %v350_v37 }
  0xdb   : > { %v416_v26 = vmul.f32 %v1800_v24, %v1800_v24  ;;  %v415_v1 = vmul.f32 %v1808_v22, %v1808_v22 }
  0xdc   : > { %v414_v23 = vmul.f32 %v1803_v21, %v1803_v21 }
  0xdd   : > { %v494_v29 = vsel %vm225_vm0, %v416_v26, 0.0  ;;  %v491_v31 = vsel %vm225_vm0, %v415_v1, 0.0 }
  0xde   : > { %v306_v14 = vpop.xlane.xlu2 %305  ;;  %495 = vadd.xlane.f32.xlu1 %v494_v29  ;;  %v488_v42 = vsel %vm225_vm0, %v414_v23, 0.0  ;;  %v303_v13 = vpop.xlane.xlu1 %302 }
  0xdf   : > { %v355_v44 = vmul.f32 %v1648_v15, %v306_v14  ;;  %483 = vadd.xlane.f32.xlu0 %v482_v25  ;;  %489 = vadd.xlane.f32.xlu2 %v488_v42  ;;  %v300_v35 = vpop.xlane.xlu0 %299  ;;  %v354_v39 = vmul.f32 %v1648_v15, %v303_v13 }
  0xe0   : > { %v353_v43 = vmul.f32 %v1648_v15, %v300_v35 }
  0xe1   : > { %v1821_v30 = vsub.f32 %v1609_v48, %v355_v44  ;;  %v1829_v46 = vsub.f32 %v1612_v49, %v354_v39 }
  0xe2   : > { %v1824_v45 = vsub.f32 %v1615_v50, %v353_v43 }
  0xe3   : > { %v419_v32 = vmul.f32 %v1821_v30, %v1821_v30  ;;  %v418_v3 = vmul.f32 %v1829_v46, %v1829_v46 }
  0xe4   : > { %v417_v53 = vmul.f32 %v1824_v45, %v1824_v45 }
  0xe5   : > { %v503_v57 = vsel %vm225_vm0, %v419_v32, 0.0  ;;  %v500_v37 = vsel %vm225_vm0, %v418_v3, 0.0 }
  0xe6   : > { %v315_v20 = vpop.xlane.xlu2 %314  ;;  %504 = vadd.xlane.f32.xlu1 %v503_v57  ;;  %v497_v48 = vsel %vm225_vm0, %v417_v53, 0.0  ;;  %v312_v19 = vpop.xlane.xlu1 %311 }
  0xe7   : > { %v358_v50 = vmul.f32 %v1648_v15, %v315_v20  ;;  %492 = vadd.xlane.f32.xlu0 %v491_v31  ;;  %498 = vadd.xlane.f32.xlu2 %v497_v48  ;;  %v309_v7 = vpop.xlane.xlu0 %308  ;;  %v357_v62 = vmul.f32 %v1648_v15, %v312_v19 }
  0xe8   : > { %v356_v49 = vmul.f32 %v1648_v15, %v309_v7 }
  0xe9   : > { %v1842_v36 = vsub.f32 %v1624_v54, %v358_v50  ;;  %v1850_v5 = vsub.f32 %v1627_v55, %v357_v62 }
  0xea   : > { %v1845_v0 = vsub.f32 %v1630_v56, %v356_v49 }
  0xeb   : > { %v422_v38 = vmul.f32 %v1842_v36, %v1842_v36  ;;  %v421_v55 = vmul.f32 %v1850_v5, %v1850_v5 }
  0xec   : > { %v420_v9 = vmul.f32 %v1845_v0, %v1845_v0 }
  0xed   : > { %v512_v16 = vsel %vm225_vm0, %v422_v38, 0.0  ;;  %v509_v42 = vsel %vm225_vm0, %v421_v55, 0.0 }
  0xee   : > { %513 = vadd.xlane.f32.xlu1 %v512_v16  ;;  %v506_v54 = vsel %vm225_vm0, %v420_v9, 0.0  ;;  %v321_v26 = vpop.xlane.xlu1 %320 }
  0xef   : > { %501 = vadd.xlane.f32.xlu0 %v500_v37  ;;  %507 = vadd.xlane.f32.xlu2 %v506_v54  ;;  %v318_v56 = vpop.xlane.xlu0 %317  ;;  %v360_v23 = vmul.f32 %v1648_v15, %v321_v26 }
  0xf0   : > { %v359_v25 = vmul.f32 %v1648_v15, %v318_v56 }
  0xf1   : > { %v1865_v14 = vsub.f32 %v1639_v60, %v360_v23 }
  0xf2   : > { %v1862_v29 = vsub.f32 %v1642_v61, %v359_v25 }
  0xf3   : > { %v424_v35 = vmul.f32 %v1865_v14, %v1865_v14 }
  0xf4   : > { %v423_v13 = vmul.f32 %v1862_v29, %v1862_v29 }
  0xf5   : > { %v518_v43 = vsel %vm225_vm0, %v424_v35, 0.0 }
  0xf6   : > { %v515_v44 = vsel %vm225_vm0, %v423_v13, 0.0 }
  0xf7   : > { %510 = vadd.xlane.f32.xlu0 %v509_v42  ;;  %516 = vadd.xlane.f32.xlu2 %v515_v44 }
  0xff   : > { %519 = vadd.xlane.f32.xlu0 %v518_v43 }
 0x119   : > { %v433_v61 = vpop.xlane.xlu1 %432 }
 0x11a   : > { %v523_v39 = vmul.f32 %v433_v61, %v1648_v15  ;;  %v427_v60 = vpop.xlane.xlu2 %426 }
 0x11b   : > { %v521_v1 = vmul.f32 %v427_v60, %v1648_v15 }
 0x11c   : > { %v555_v32 = vadd.f32 1e-06, %v523_v39 }
 0x11d   : > { %v553_v31 = vadd.f32 1e-06, %v521_v1 }
 0x11e   : > { %1201 = vrsqrt.f32 %v555_v32  ;;  %vm611_vm2 = vweird.f32 %v555_v32 }
 0x11f   : > { %1203 = vrsqrt.f32 %v553_v31  ;;  %vm591_vm4 = vweird.f32 %v553_v31 }
 0x121   : > { %v442_v53 = vpop.xlane.xlu1 %441 }
 0x122   : > { %v526_v57 = vmul.f32 %v442_v53, %v1648_v15  ;;  %v436_v20 = vpop.xlane.xlu2 %435  ;;  %v430_v48 = vpop.xlane.xlu0 %429 }
 0x123   : > { %v524_v19 = vmul.f32 %v436_v20, %v1648_v15  ;;  %v522_v50 = vmul.f32 %v430_v48, %v1648_v15  ;;  %v1907_v20 = vld [vmem:[%s2578_s1] ss:$0 sm:$0xff] }
 0x124   : > { %v1202_v7 = vpop.eup %1201  ;;  %v1879_v49 = vadd.f32 1e-06, %v526_v57 }
 0x125   : > { %v1204_v62 = vpop.eup %1203  ;;  %v606_v3 = vmul.f32 %v1202_v7, %v555_v32  ;;  %v1881_v38 = vadd.f32 1e-06, %v524_v19  ;;  %v1883_v37 = vadd.f32 1e-06, %v522_v50  ;;  %vm612_vm3 = vweird.f32 %v1202_v7  ;;  %v1924_v32 = vld [vmem:[%s2579_s2] ss:$0 sm:$0xff] }
 0x126   : > { %v586_v9 = vmul.f32 %v1204_v62, %v553_v31  ;;  %1205 = vrsqrt.f32 %v1879_v49  ;;  %vm592_vm5 = vweird.f32 %v1204_v62  ;;  %vm641_vm6 = vweird.f32 %v1879_v49  ;;  %vm613_vm8 = vmor %vm611_vm2, %vm612_vm3 }
 0x127   : > { %v607_v16 = vmul.f32 %v1202_v7, %v606_v3  ;;  %1207 = vrsqrt.f32 %v1881_v38  ;;  %vm621_vm7 = vweird.f32 %v1881_v38  ;;  %vm593_vm9 = vmor %vm591_vm4, %vm592_vm5  ;;  %vm601_vm10 = vweird.f32 %v1883_v37 }
 0x128   : > { %v587_v54 = vmul.f32 %v1204_v62, %v586_v9  ;;  %1209 = vrsqrt.f32 %v1883_v37 }
 0x129   : > { %v608_v26 = vmul.f32 0.5, %v607_v16  ;;  %v451_v56 = vpop.xlane.xlu1 %450 }
 0x12a   : > { %v588_v25 = vmul.f32 0.5, %v587_v54  ;;  %v529_v23 = vmul.f32 %v451_v56, %v1648_v15  ;;  %v445_v55 = vpop.xlane.xlu2 %444  ;;  %v439_v42 = vpop.xlane.xlu0 %438 }
 0x12b   : > { %v609_v13 = vsub.f32 1.5, %v608_v26  ;;  %v527_v44 = vmul.f32 %v445_v55, %v1648_v15  ;;  %v525_v50 = vmul.f32 %v439_v42, %v1648_v15 }
 0x12c   : > { %v1890_v35 = vpop.eup %1205  ;;  %v589_v43 = vsub.f32 1.5, %v588_v25  ;;  %v1893_v61 = vadd.f32 1e-06, %v529_v23 }
 0x12d   : > { %v1895_v39 = vpop.eup %1207  ;;  %v610_v60 = vmul.f32 %v1202_v7, %v609_v13  ;;  %v636_v1 = vmul.f32 %v1890_v35, %v1879_v49  ;;  %v1900_v53 = vadd.f32 1e-06, %v527_v44  ;;  %vm642_vm11 = vweird.f32 %v1890_v35 }
 0x12e   : > { %v1902_v57 = vpop.eup %1209  ;;  %v590_v48 = vmul.f32 %v1204_v62, %v589_v43  ;;  %v616_v19 = vmul.f32 %v1895_v39, %v1881_v38  ;;  %1211 = vrsqrt.f32 %v1893_v61  ;;  %vm622_vm12 = vweird.f32 %v1895_v39  ;;  %vm1945_vm13 = vmor %vm641_vm6, %vm642_vm11 }
 0x12f   : > { %v614_v3 = vsel %vm613_vm8, %v1202_v7, %v610_v60  ;;  %v637_v9 = vmul.f32 %v1890_v35, %v636_v1  ;;  %v596_v16 = vmul.f32 %v1902_v57, %v1883_v37  ;;  %1213 = vrsqrt.f32 %v1900_v53  ;;  %vm623_vm2 = vmor %vm621_vm7, %vm622_vm12 }
 0x130   : > { %v907_v54 = vmul.f32 %v614_v3, %v1653_v27  ;;  %v594_v26 = vsel %vm593_vm9, %v1204_v62, %v590_v48  ;;  %v617_v31 = vmul.f32 %v1895_v39, %v616_v19  ;;  %v1934_v13 = vadd.f32 1e-06, %v525_v50 }
 0x131   : > { %v905_v7 = vmul.f32 %v594_v26, %v1656_v28  ;;  %v638_v56 = vmul.f32 0.5, %v637_v9  ;;  %v597_v25 = vmul.f32 %v1902_v57, %v596_v16  ;;  %v460_v23 = vpop.xlane.xlu1 %459  ;;  %vm602_vm14 = vweird.f32 %v1902_v57 }
 0x132   : > { %v944_v55 = vmul.f32 %v1907_v20, %v907_v54  ;;  %v618_v42 = vmul.f32 0.5, %v617_v31  ;;  %v454_v27 = vpop.xlane.xlu2 %453  ;;  %v448_v62 = vpop.xlane.xlu0 %447  ;;  %v532_v60 = vmul.f32 %v460_v23, %v1648_v15  ;;  %1215 = vrsqrt.f32 %v1934_v13  ;;  %vm603_vm3 = vmor %vm601_vm10, %vm602_vm14 }
 0x133   : > { %v942_v44 = vmul.f32 %v1907_v20, %v905_v7  ;;  %v639_v43 = vsub.f32 1.5, %v638_v56  ;;  %v598_v28 = vmul.f32 0.5, %v597_v25  ;;  %vm671_vm15 = vweird.f32 %v1893_v61 }
 0x134   : > { %v1938_v1 = vpop.eup %1211  ;;  %v979_v48 = vadd.f32 %v1924_v32, %v944_v55  ;;  %v619_v50 = vsub.f32 1.5, %v618_v42  ;;  %v1964_v26 = vadd.f32 1e-06, %v532_v60  ;;  %v530_v23 = vmul.f32 %v454_v27, %v1648_v15 }
 0x135   : > { %v977_v3 = vadd.f32 %v1924_v32, %v942_v44  ;;  %v640_v9 = vmul.f32 %v1890_v35, %v639_v43  ;;  %v599_v16 = vsub.f32 1.5, %v598_v28  ;;  %v666_v54 = vmul.f32 %v1938_v1, %v1893_v61  ;;  %v1966_v31 = vpop.eup %1213 }
 0x136   : > { %1011 = vst.msk [vmem:[%s1957_s9 + $0x10] sm:$0xff] %vm225_vm0, %v979_v48  ;;  %v620_v49 = vmul.f32 %v1895_v39, %v619_v50  ;;  %vm672_vm1 = vweird.f32 %v1938_v1  ;;  %v528_v38 = vmul.f32 %v448_v62, %v1648_v15  ;;  %1217 = vrsqrt.f32 %v1964_v26 }
 0x137   : > { %1009 = vst.msk [vmem:[%s1957_s9] sm:$0xff] %vm225_vm0, %v977_v3  ;;  %v644_v7 = vsel %vm1945_vm13, %v1890_v35, %v640_v9  ;;  %v600_v56 = vmul.f32 %v1902_v57, %v599_v16  ;;  %v667_v25 = vmul.f32 %v1938_v1, %v666_v54  ;;  %v646_v35 = vmul.f32 %v1966_v31, %v1900_v53  ;;  %vm2007_vm5 = vmor %vm671_vm15, %vm672_vm1 }
 0x138   : > { %v910_v55 = vmul.f32 %v644_v7, %v1669_v47  ;;  %v624_v42 = vsel %vm623_vm2, %v1895_v39, %v620_v49  ;;  %v1992_v27 = vpop.eup %1215  ;;  %vm651_vm4 = vweird.f32 %v1900_v53  ;;  %v2011_v16 = vadd.f32 1e-06, %v530_v23 }
 0x139   : > { %v908_v44 = vmul.f32 %v624_v42, %v1672_v51  ;;  %v604_v43 = vsel %vm603_vm3, %v1902_v57, %v600_v56  ;;  %v668_v28 = vmul.f32 0.5, %v667_v25  ;;  %v469_v47 = vpop.xlane.xlu1 %468  ;;  %v647_v60 = vmul.f32 %v1966_v31, %v646_v35 }
 0x13a   : > { %v947_v39 = vmul.f32 %v1907_v20, %v910_v55  ;;  %v906_v37 = vmul.f32 %v604_v43, %v1675_v52  ;;  %v463_v48 = vpop.xlane.xlu2 %462  ;;  %v457_v19 = vpop.xlane.xlu0 %456  ;;  %v626_v57 = vmul.f32 %v1992_v27, %v1934_v13  ;;  %v2016_v56 = vadd.f32 1e-06, %v528_v38 }
 0x13b   : > { %v945_v62 = vmul.f32 %v1907_v20, %v908_v44  ;;  %v669_v51 = vsub.f32 1.5, %v668_v28  ;;  %v648_v9 = vmul.f32 0.5, %v647_v60  ;;  %vm652_vm6 = vweird.f32 %v1966_v31 }
 0x13c   : > { %v982_v50 = vadd.f32 %v1924_v32, %v947_v39  ;;  %v943_v3 = vmul.f32 %v1907_v20, %v906_v37  ;;  %v627_v7 = vmul.f32 %v1992_v27, %v626_v57  ;;  %1219 = vrsqrt.f32 %v2011_v16  ;;  %v2023_v23 = vpop.eup %1217  ;;  %vm653_vm9 = vmor %vm651_vm4, %vm652_vm6 }
 0x13d   : > { %v980_v54 = vadd.f32 %v1924_v32, %v945_v62  ;;  %v670_v49 = vmul.f32 %v1938_v1, %v669_v51  ;;  %v649_v25 = vsub.f32 1.5, %v648_v9  ;;  %vm631_vm7 = vweird.f32 %v1934_v13 }
 0x13e   : > { %1014 = vst.msk [vmem:[%s1957_s9 + $0x28] sm:$0xff] %vm225_vm0, %v982_v50  ;;  %v978_v61 = vadd.f32 %v1924_v32, %v943_v3  ;;  %v628_v42 = vmul.f32 0.5, %v627_v7  ;;  %1221 = vrsqrt.f32 %v2016_v56  ;;  %vm632_vm8 = vweird.f32 %v1992_v27 }
 0x13f   : > { %1012 = vst.msk [vmem:[%s1957_s9 + $0x18] sm:$0xff] %vm225_vm0, %v980_v54  ;;  %v674_v55 = vsel %vm2007_vm5, %v1938_v1, %v670_v49  ;;  %v650_v38 = vmul.f32 %v1966_v31, %v649_v25  ;;  %v696_v44 = vmul.f32 %v2023_v23, %v1964_v26  ;;  %v535_v43 = vmul.f32 %v469_v47, %v1648_v15  ;;  %vm633_vm11 = vmor %vm631_vm7, %vm632_vm8 }
 0x140   : > { %1010 = vst.msk [vmem:[%s1957_s9 + $0x8] sm:$0xff] %vm225_vm0, %v978_v61  ;;  %v913_v35 = vmul.f32 %v674_v55, %v1695_v10  ;;  %v629_v1 = vsub.f32 1.5, %v628_v42  ;;  %v533_v28 = vmul.f32 %v463_v48, %v1648_v15  ;;  %v531_v39 = vmul.f32 %v457_v19, %v1648_v15 }
 0x141   : > { %v478_v37 = vpop.xlane.xlu1 %477  ;;  %v654_v60 = vsel %vm653_vm9, %v1966_v31, %v650_v38  ;;  %v697_v62 = vmul.f32 %v2023_v23, %v696_v44  ;;  %vm701_vm10 = vweird.f32 %v1964_v26  ;;  %v2051_v48 = vadd.f32 1e-06, %v535_v43 }
 0x142   : > { %v950_v10 = vmul.f32 %v1907_v20, %v913_v35  ;;  %v538_v51 = vmul.f32 %v478_v37, %v1648_v15  ;;  %v472_v57 = vpop.xlane.xlu2 %471  ;;  %v466_v50 = vpop.xlane.xlu0 %465  ;;  %v911_v53 = vmul.f32 %v654_v60, %v1698_v11  ;;  %v630_v47 = vmul.f32 %v1992_v27, %v629_v1 }
 0x143   : > { %v2053_v19 = vpop.eup %1219  ;;  %v698_v31 = vmul.f32 0.5, %v697_v62  ;;  %vm702_vm12 = vweird.f32 %v2023_v23  ;;  %v2061_v52 = vadd.f32 1e-06, %v533_v28  ;;  %v2069_v7 = vadd.f32 1e-06, %v531_v39 }
 0x144   : > { %v985_v3 = vadd.f32 %v1924_v32, %v950_v10  ;;  %v2063_v11 = vpop.eup %1221  ;;  %v948_v9 = vmul.f32 %v1907_v20, %v911_v53  ;;  %v634_v54 = vsel %vm633_vm11, %v1992_v27, %v630_v47  ;;  %v676_v49 = vmul.f32 %v2053_v19, %v2011_v16  ;;  %vm2081_vm13 = vmor %vm701_vm10, %vm702_vm12 }
 0x145   : > { %v909_v13 = vmul.f32 %v634_v54, %v1682_v58  ;;  %v699_v61 = vsub.f32 1.5, %v698_v31  ;;  %v656_v25 = vmul.f32 %v2063_v11, %v2016_v56  ;;  %v2076_v55 = vadd.f32 1e-06, %v538_v51 }
 0x146   : > { %1017 = vst.msk [vmem:[%s1957_s9 + $0x40] sm:$0xff] %vm225_vm0, %v985_v3  ;;  %v983_v42 = vadd.f32 %v1924_v32, %v948_v9  ;;  %v677_v35 = vmul.f32 %v2053_v19, %v676_v49  ;;  %vm681_vm14 = vweird.f32 %v2011_v16  ;;  %1223 = vrsqrt.f32 %v2051_v48 }
 0x147   : > { %v946_v58 = vmul.f32 %v1907_v20, %v909_v13  ;;  %v700_v38 = vmul.f32 %v2023_v23, %v699_v61  ;;  %v657_v44 = vmul.f32 %v2063_v11, %v656_v25  ;;  %1225 = vrsqrt.f32 %v2061_v52 }
 0x148   : > { %1015 = vst.msk [vmem:[%s1957_s9 + $0x30] sm:$0xff] %vm225_vm0, %v983_v42  ;;  %v678_v26 = vmul.f32 0.5, %v677_v35  ;;  %vm682_vm15 = vweird.f32 %v2053_v19  ;;  %vm661_vm1 = vweird.f32 %v2016_v56  ;;  %1227 = vrsqrt.f32 %v2069_v7 }
 0x149   : > { %v981_v1 = vadd.f32 %v1924_v32, %v946_v58  ;;  %v704_v43 = vsel %vm2081_vm13, %v2023_v23, %v700_v38  ;;  %v658_v28 = vmul.f32 0.5, %v657_v44  ;;  %1229 = vrsqrt.f32 %v2076_v55  ;;  %v487_v39 = vpop.xlane.xlu1 %486  ;;  %vm683_vm6 = vmor %vm681_vm14, %vm682_vm15 }
 0x14a   : > { %v481_v37 = vpop.xlane.xlu2 %480  ;;  %v916_v10 = vmul.f32 %v704_v43, %v1716_v40  ;;  %v679_v60 = vsub.f32 1.5, %v678_v26  ;;  %vm662_vm2 = vweird.f32 %v2063_v11  ;;  %v536_v62 = vmul.f32 %v472_v57, %v1648_v15  ;;  %v475_v51 = vpop.xlane.xlu0 %474 }
 0x14b   : > { %1013 = vst.msk [vmem:[%s1957_s9 + $0x20] sm:$0xff] %vm225_vm0, %v981_v1  ;;  %v659_v53 = vsub.f32 1.5, %v658_v28  ;;  %vm731_vm3 = vweird.f32 %v2051_v48  ;;  %vm711_vm4 = vweird.f32 %v2061_v52  ;;  %v534_v23 = vmul.f32 %v466_v50, %v1648_v15  ;;  %vm663_vm7 = vmor %vm661_vm1, %vm662_vm2 }
 0x14c   : > { %v2110_v47 = vpop.eup %1223  ;;  %v953_v3 = vmul.f32 %v1907_v20, %v916_v10  ;;  %v680_v40 = vmul.f32 %v2053_v19, %v679_v60  ;;  %vm761_vm5 = vweird.f32 %v2076_v55  ;;  %v541_v57 = vmul.f32 %v487_v39, %v1648_v15 }
 0x14d   : > { %v539_v31 = vmul.f32 %v481_v37, %v1648_v15  ;;  %v2117_v9 = vpop.eup %1225  ;;  %v660_v50 = vmul.f32 %v2063_v11, %v659_v53  ;;  %v726_v54 = vmul.f32 %v2110_v47, %v2051_v48  ;;  %v2126_v49 = vadd.f32 1e-06, %v536_v62 }
 0x14e   : > { %v537_v13 = vmul.f32 %v475_v51, %v1648_v15  ;;  %v2129_v61 = vpop.eup %1227  ;;  %v988_v25 = vadd.f32 %v1924_v32, %v953_v3  ;;  %v684_v42 = vsel %vm683_vm6, %v2053_v19, %v680_v40  ;;  %vm732_vm8 = vweird.f32 %v2110_v47 }
 0x14f   : > { %v706_v16 = vmul.f32 %v2117_v9, %v2061_v52  ;;  %v1230_v27 = vpop.eup %1229  ;;  %v914_v35 = vmul.f32 %v684_v42, %v1719_v41  ;;  %v664_v58 = vsel %vm663_vm7, %v2063_v11, %v660_v50  ;;  %v727_v38 = vmul.f32 %v2110_v47, %v726_v54  ;;  %vm2163_vm11 = vmor %vm731_vm3, %vm732_vm8 }
 0x150   : > { %v686_v19 = vmul.f32 %v2129_v61, %v2069_v7  ;;  %1020 = vst.msk [vmem:[%s1957_s9 + $0x58] sm:$0xff] %vm225_vm0, %v988_v25  ;;  %v912_v56 = vmul.f32 %v664_v58, %v1703_v17  ;;  %v756_v26 = vmul.f32 %v1230_v27, %v2076_v55  ;;  %v2150_v1 = vadd.f32 1e-06, %v534_v23 }
 0x151   : > { %v707_v44 = vmul.f32 %v2117_v9, %v706_v16  ;;  %v951_v43 = vmul.f32 %v1907_v20, %v914_v35  ;;  %v728_v41 = vmul.f32 0.5, %v727_v38  ;;  %vm712_vm9 = vweird.f32 %v2117_v9 }
 0x152   : > { %v687_v11 = vmul.f32 %v2129_v61, %v686_v19  ;;  %v949_v28 = vmul.f32 %v1907_v20, %v912_v56  ;;  %v757_v37 = vmul.f32 %v1230_v27, %v756_v26  ;;  %1231 = vrsqrt.f32 %v2126_v49  ;;  %v2174_v54 = vpop.xlane.xlu0 %483  ;;  %vm2183_vm13 = vmor %vm711_vm4, %vm712_vm9 }
 0x153   : > { %v708_v39 = vmul.f32 0.5, %v707_v44  ;;  %v986_v17 = vadd.f32 %v1924_v32, %v951_v43  ;;  %v729_v10 = vsub.f32 1.5, %v728_v41  ;;  %vm762_vm10 = vweird.f32 %v1230_v27 }
 0x154   : > { %v688_v60 = vmul.f32 0.5, %v687_v11  ;;  %v984_v62 = vadd.f32 %v1924_v32, %v949_v28  ;;  %v758_v23 = vmul.f32 0.5, %v757_v37  ;;  %1233 = vrsqrt.f32 %v2150_v1  ;;  %vm2197_vm15 = vmor %vm761_vm5, %vm762_vm10 }
 0x155   : > { %v709_v53 = vsub.f32 1.5, %v708_v39  ;;  %1018 = vst.msk [vmem:[%s1957_s9 + $0x48] sm:$0xff] %vm225_vm0, %v986_v17  ;;  %v730_v3 = vmul.f32 %v2110_v47, %v729_v10  ;;  %vm692_vm12 = vweird.f32 %v2129_v61  ;;  %v2172_v50 = vadd.f32 1e-06, %v541_v57  ;;  %v490_v57 = vpop.xlane.xlu2 %489 }
 0x156   : > { %v689_v40 = vsub.f32 1.5, %v688_v60  ;;  %1016 = vst.msk [vmem:[%s1957_s9 + $0x38] sm:$0xff] %vm225_vm0, %v984_v62  ;;  %vm691_vm14 = vweird.f32 %v2069_v7  ;;  %v759_v42 = vsub.f32 1.5, %v758_v23  ;;  %v2188_v16 = vadd.f32 1e-06, %v539_v31  ;;  %v496_v31 = vpop.xlane.xlu1 %495 }
 0x157   : > { %v710_v48 = vmul.f32 %v2117_v9, %v709_v53  ;;  %v734_v35 = vsel %vm2163_vm11, %v2110_v47, %v730_v3  ;;  %1235 = vrsqrt.f32 %v2172_v50  ;;  %v2202_v7 = vadd.f32 1e-06, %v537_v13  ;;  %vm693_vm1 = vmor %vm691_vm14, %vm692_vm12 }
 0x158   : > { %v690_v58 = vmul.f32 %v2129_v61, %v689_v40  ;;  %v2204_v38 = vpop.eup %1231  ;;  %v919_v19 = vmul.f32 %v734_v35, %v1737_v8  ;;  %v760_v55 = vmul.f32 %v1230_v27, %v759_v42  ;;  %1237 = vrsqrt.f32 %v2188_v16 }
 0x159   : > { %v714_v47 = vsel %vm2183_vm13, %v2117_v9, %v710_v48  ;;  %v736_v44 = vmul.f32 %v2204_v38, %v2126_v49  ;;  %vm741_vm2 = vweird.f32 %v2126_v49  ;;  %vm721_vm3 = vweird.f32 %v2150_v1 }
 0x15a   : > { %v917_v56 = vmul.f32 %v714_v47, %v1740_v63  ;;  %v694_v13 = vsel %vm693_vm1, %v2129_v61, %v690_v58  ;;  %v2217_v26 = vpop.eup %1233  ;;  %v956_v8 = vmul.f32 %v1907_v20, %v919_v19  ;;  %v764_v9 = vsel %vm2197_vm15, %v1230_v27, %v760_v55  ;;  %v2253_v40 = vpop.xlane.xlu0 %492 }
 0x15b   : > { %v915_v43 = vmul.f32 %v694_v13, %v1724_v2  ;;  %v922_v63 = vmul.f32 %v764_v9, %v1758_v12  ;;  %v737_v61 = vmul.f32 %v2204_v38, %v736_v44  ;;  %v716_v11 = vmul.f32 %v2217_v26, %v2150_v1 }
 0x15c   : > { %v954_v41 = vmul.f32 %v1907_v20, %v917_v56  ;;  %v991_v2 = vadd.f32 %v1924_v32, %v956_v8  ;;  %vm791_vm4 = vweird.f32 %v2172_v50  ;;  %1239 = vrsqrt.f32 %v2202_v7 }
 0x15d   : > { %v952_v28 = vmul.f32 %v1907_v20, %v915_v43  ;;  %v2234_v27 = vpop.eup %1235  ;;  %v959_v39 = vmul.f32 %v1907_v20, %v922_v63  ;;  %v738_v37 = vmul.f32 0.5, %v737_v61  ;;  %v717_v17 = vmul.f32 %v2217_v26, %v716_v11  ;;  %v499_v35 = vpop.xlane.xlu2 %498 }
 0x15e   : > { %v989_v12 = vadd.f32 %v1924_v32, %v954_v41  ;;  %v2239_v10 = vpop.eup %1237  ;;  %1023 = vst.msk [vmem:[%s1957_s9 + $0x70] sm:$0xff] %vm225_vm0, %v991_v2  ;;  %vm742_vm5 = vweird.f32 %v2204_v38  ;;  %v786_v62 = vmul.f32 %v2234_v27, %v2172_v50  ;;  %vm771_vm6 = vweird.f32 %v2188_v16  ;;  %v505_v47 = vpop.xlane.xlu1 %504 }
 0x15f   : > { %v987_v60 = vadd.f32 %v1924_v32, %v952_v28  ;;  %v994_v51 = vadd.f32 %v1924_v32, %v959_v39  ;;  %v739_v53 = vsub.f32 1.5, %v738_v37  ;;  %v718_v23 = vmul.f32 0.5, %v717_v17  ;;  %vm743_vm9 = vmor %vm741_vm2, %vm742_vm5 }
 0x160   : > { %1021 = vst.msk [vmem:[%s1957_s9 + $0x60] sm:$0xff] %vm225_vm0, %v989_v12  ;;  %v766_v3 = vmul.f32 %v2239_v10, %v2188_v16  ;;  %vm722_vm7 = vweird.f32 %v2217_v26  ;;  %v787_v48 = vmul.f32 %v2234_v27, %v786_v62  ;;  %v544_v25 = vmul.f32 %v496_v31, %v1648_v15 }
 0x161   : > { %1019 = vst.msk [vmem:[%s1957_s9 + $0x50] sm:$0xff] %vm225_vm0, %v987_v60  ;;  %v542_v42 = vmul.f32 %v490_v57, %v1648_v15  ;;  %v740_v58 = vmul.f32 %v2204_v38, %v739_v53  ;;  %v719_v52 = vsub.f32 1.5, %v718_v23  ;;  %vm792_vm8 = vweird.f32 %v2234_v27  ;;  %vm723_vm10 = vmor %vm721_vm3, %vm722_vm7 }
 0x162   : > { %1026 = vst.msk [vmem:[%s1957_s9 + $0x88] sm:$0xff] %vm225_vm0, %v994_v51  ;;  %v767_v19 = vmul.f32 %v2239_v10, %v766_v3  ;;  %v1240_v55 = vpop.eup %1239  ;;  %v788_v31 = vmul.f32 0.5, %v787_v48  ;;  %v2270_v56 = vadd.f32 1e-06, %v544_v25  ;;  %v540_v13 = vmul.f32 %v2174_v54, %v1648_v15  ;;  %vm2291_vm11 = vmor %vm791_vm4, %vm792_vm8  ;;  %v2315_v51 = vpop.xlane.xlu0 %501 }
 0x163   : > { %v2272_v57 = vadd.f32 1e-06, %v542_v42  ;;  %v744_v44 = vsel %vm743_vm9, %v2204_v38, %v740_v58  ;;  %v720_v8 = vmul.f32 %v2217_v26, %v719_v52  ;;  %v746_v9 = vmul.f32 %v1240_v55, %v2202_v7 }
 0x164   : > { %v768_v43 = vmul.f32 0.5, %v767_v19  ;;  %v920_v41 = vmul.f32 %v744_v44, %v1761_v33  ;;  %v789_v49 = vsub.f32 1.5, %v788_v31  ;;  %1241 = vrsqrt.f32 %v2270_v56 }
 0x165   : > { %v547_v63 = vmul.f32 %v505_v47, %v1648_v15  ;;  %v724_v54 = vsel %vm723_vm10, %v2217_v26, %v720_v8  ;;  %vm772_vm12 = vweird.f32 %v2239_v10  ;;  %v747_v1 = vmul.f32 %v1240_v55, %v746_v9  ;;  %v508_v23 = vpop.xlane.xlu2 %507 }
 0x166   : > { %v769_v33 = vsub.f32 1.5, %v768_v43  ;;  %v957_v61 = vmul.f32 %v1907_v20, %v920_v41  ;;  %v918_v11 = vmul.f32 %v724_v54, %v1745_v4  ;;  %v790_v2 = vmul.f32 %v2234_v27, %v789_v49  ;;  %vm773_vm14 = vmor %vm771_vm6, %vm772_vm12  ;;  %v514_v47 = vpop.xlane.xlu1 %513 }
 0x167   : > { %1243 = vrsqrt.f32 %v2272_v57  ;;  %v748_v50 = vmul.f32 0.5, %v747_v1  ;;  %vm752_vm13 = vweird.f32 %v1240_v55  ;;  %v2301_v28 = vadd.f32 1e-06, %v540_v13 }
 0x168   : > { %v770_v26 = vmul.f32 %v2239_v10, %v769_v33  ;;  %v992_v12 = vadd.f32 %v1924_v32, %v957_v61  ;;  %v955_v39 = vmul.f32 %v1907_v20, %v918_v11  ;;  %v794_v37 = vsel %vm2291_vm11, %v2234_v27, %v790_v2 }
 0x169   : > { %v2310_v4 = vadd.f32 1e-06, %v547_v63  ;;  %v925_v17 = vmul.f32 %v794_v37, %v1779_v18  ;;  %v749_v62 = vsub.f32 1.5, %v748_v50  ;;  %1245 = vrsqrt.f32 %v2301_v28 }
 0x16a   : > { %v774_v60 = vsel %vm773_vm14, %v2239_v10, %v770_v26  ;;  %v2317_v53 = vpop.eup %1241  ;;  %1024 = vst.msk [vmem:[%s1957_s9 + $0x78] sm:$0xff] %vm225_vm0, %v992_v12  ;;  %v990_v27 = vadd.f32 %v1924_v32, %v955_v39  ;;  %vm751_vm15 = vweird.f32 %v2202_v7  ;;  %vm821_vm2 = vweird.f32 %v2270_v56  ;;  %v2383_v26 = vpop.xlane.xlu0 %510 }
 0x16b   : > { %v923_v16 = vmul.f32 %v774_v60, %v1782_v59  ;;  %1247 = vrsqrt.f32 %v2310_v4  ;;  %v962_v18 = vmul.f32 %v1907_v20, %v925_v17  ;;  %v750_v3 = vmul.f32 %v1240_v55, %v749_v62  ;;  %vm753_vm1 = vmor %vm751_vm15, %vm752_vm13 }
 0x16c   : > { %v816_v10 = vmul.f32 %v2317_v53, %v2270_v56  ;;  %1022 = vst.msk [vmem:[%s1957_s9 + $0x68] sm:$0xff] %vm225_vm0, %v990_v27  ;;  %v545_v59 = vmul.f32 %v499_v35, %v1648_v15  ;;  %v543_v42 = vmul.f32 %v2253_v40, %v1648_v15  ;;  %vm801_vm3 = vweird.f32 %v2272_v57 }
 0x16d   : > { %v2328_v48 = vpop.eup %1243  ;;  %v960_v25 = vmul.f32 %v1907_v20, %v923_v16  ;;  %v997_v7 = vadd.f32 %v1924_v32, %v962_v18  ;;  %v754_v58 = vsel %vm753_vm1, %v1240_v55, %v750_v3  ;;  %vm822_vm4 = vweird.f32 %v2317_v53  ;;  %v517_v39 = vpop.xlane.xlu2 %516 }
 0x16e   : > { %v817_v52 = vmul.f32 %v2317_v53, %v816_v10  ;;  %v796_v19 = vmul.f32 %v2328_v48, %v2272_v57  ;;  %v921_v13 = vmul.f32 %v754_v58, %v1766_v34  ;;  %v2345_v35 = vadd.f32 1e-06, %v545_v59  ;;  %vm2373_vm7 = vmor %vm821_vm2, %vm822_vm4 }
 0x16f   : > { %v995_v31 = vadd.f32 %v1924_v32, %v960_v25  ;;  %v2347_v44 = vpop.eup %1245  ;;  %1029 = vst.msk [vmem:[%s1957_s9 + $0xa0] sm:$0xff] %vm225_vm0, %v997_v7  ;;  %v2353_v8 = vadd.f32 1e-06, %v543_v42  ;;  %vm781_vm5 = vweird.f32 %v2301_v28  ;;  %v550_v41 = vmul.f32 %v514_v47, %v1648_v15 }
 0x170   : > { %v818_v40 = vmul.f32 0.5, %v817_v52  ;;  %v797_v55 = vmul.f32 %v2328_v48, %v796_v19  ;;  %v958_v34 = vmul.f32 %v1907_v20, %v921_v13  ;;  %v776_v9 = vmul.f32 %v2347_v44, %v2301_v28 }
 0x171   : > { %v2355_v43 = vpop.eup %1247  ;;  %1027 = vst.msk [vmem:[%s1957_s9 + $0x90] sm:$0xff] %vm225_vm0, %v995_v31  ;;  %1249 = vrsqrt.f32 %v2345_v35  ;;  %vm851_vm6 = vweird.f32 %v2310_v4  ;;  %vm802_vm8 = vweird.f32 %v2328_v48  ;;  %vm782_vm9 = vweird.f32 %v2347_v44 }
 0x172   : > { %v819_v49 = vsub.f32 1.5, %v818_v40  ;;  %v798_v63 = vmul.f32 0.5, %v797_v55  ;;  %v846_v54 = vmul.f32 %v2355_v43, %v2310_v4  ;;  %v993_v38 = vadd.f32 %v1924_v32, %v958_v34  ;;  %vm803_vm12 = vmor %vm801_vm3, %vm802_vm8 }
 0x173   : > { %v777_v1 = vmul.f32 %v2347_v44, %v776_v9  ;;  %1251 = vrsqrt.f32 %v2353_v8  ;;  %vm852_vm10 = vweird.f32 %v2355_v43  ;;  %v2388_v50 = vadd.f32 1e-06, %v550_v41  ;;  %vm783_vm14 = vmor %vm781_vm5, %vm782_vm9 }
 0x174   : > { %v820_v61 = vmul.f32 %v2317_v53, %v819_v49  ;;  %v799_v11 = vsub.f32 1.5, %v798_v63  ;;  %v847_v2 = vmul.f32 %v2355_v43, %v846_v54  ;;  %1025 = vst.msk [vmem:[%s1957_s9 + $0x80] sm:$0xff] %vm225_vm0, %v993_v38  ;;  %v548_v12 = vmul.f32 %v508_v23, %v1648_v15  ;;  %vm2417_vm13 = vmor %vm851_vm6, %vm852_vm10 }
 0x175   : > { %v778_v56 = vmul.f32 0.5, %v777_v1  ;;  %vm831_vm11 = vweird.f32 %v2345_v35  ;;  %1253 = vrsqrt.f32 %v2388_v50  ;;  %v551_v10 = vmul.f32 %v517_v39, %v1648_v15 }
 0x176   : > { %v824_v37 = vsel %vm2373_vm7, %v2317_v53, %v820_v61  ;;  %v800_v17 = vmul.f32 %v2328_v48, %v799_v11  ;;  %v848_v60 = vmul.f32 0.5, %v847_v2  ;;  %v546_v53 = vmul.f32 %v2315_v51, %v1648_v15 }
 0x177   : > { %v2396_v62 = vpop.eup %1249  ;;  %v928_v27 = vmul.f32 %v824_v37, %v1800_v24  ;;  %v779_v16 = vsub.f32 1.5, %v778_v56  ;;  %vm811_vm15 = vweird.f32 %v2353_v8  ;;  %vm881_vm1 = vweird.f32 %v2388_v50 }
 0x178   : > { %v804_v23 = vsel %vm803_vm12, %v2328_v48, %v800_v17  ;;  %v849_v18 = vsub.f32 1.5, %v848_v60  ;;  %v826_v3 = vmul.f32 %v2396_v62, %v2345_v35  ;;  %v2421_v48 = vadd.f32 1e-06, %v548_v12 }
 0x179   : > { %v1252_v24 = vpop.eup %1251  ;;  %v965_v25 = vmul.f32 %v1907_v20, %v928_v27  ;;  %v926_v57 = vmul.f32 %v804_v23, %v1803_v21  ;;  %v780_v59 = vmul.f32 %v2347_v44, %v779_v16  ;;  %vm832_vm2 = vweird.f32 %v2396_v62 }
 0x17a   : > { %v850_v21 = vmul.f32 %v2355_v43, %v849_v18  ;;  %v827_v42 = vmul.f32 %v2396_v62, %v826_v3  ;;  %v806_v7 = vmul.f32 %v1252_v24, %v2353_v8  ;;  %1255 = vrsqrt.f32 %v2421_v48  ;;  %vm833_vm5 = vmor %vm831_vm11, %vm832_vm2 }
 0x17b   : > { %v1000_v4 = vadd.f32 %v1924_v32, %v965_v25  ;;  %v963_v58 = vmul.f32 %v1907_v20, %v926_v57  ;;  %v784_v52 = vsel %vm783_vm14, %v2347_v44, %v780_v59  ;;  %v1254_v13 = vpop.eup %1253  ;;  %v2445_v44 = vadd.f32 1e-06, %v546_v53 }
 0x17c   : > { %v924_v28 = vmul.f32 %v784_v52, %v1787_v6  ;;  %v854_v19 = vsel %vm2417_vm13, %v2355_v43, %v850_v21  ;;  %v828_v47 = vmul.f32 0.5, %v827_v42  ;;  %v807_v31 = vmul.f32 %v1252_v24, %v806_v7  ;;  %v520_v43 = vpop.xlane.xlu0 %519 }
 0x17d   : > { %1032 = vst.msk [vmem:[%s1957_s9 + $0xb8] sm:$0xff] %vm225_vm0, %v1000_v4  ;;  %v998_v40 = vadd.f32 %v1924_v32, %v963_v58  ;;  %v931_v55 = vmul.f32 %v854_v19, %v1821_v30  ;;  %v876_v41 = vmul.f32 %v1254_v13, %v2388_v50  ;;  %vm812_vm3 = vweird.f32 %v1252_v24 }
 0x17e   : > { %v961_v34 = vmul.f32 %v1907_v20, %v924_v28  ;;  %v829_v6 = vsub.f32 1.5, %v828_v47  ;;  %v808_v9 = vmul.f32 0.5, %v807_v31  ;;  %vm882_vm4 = vweird.f32 %v1254_v13  ;;  %vm813_vm6 = vmor %vm811_vm15, %vm812_vm3 }
 0x17f   : > { %1030 = vst.msk [vmem:[%s1957_s9 + $0xa8] sm:$0xff] %vm225_vm0, %v998_v40  ;;  %v968_v49 = vmul.f32 %v1907_v20, %v931_v55  ;;  %1257 = vrsqrt.f32 %v2445_v44  ;;  %v877_v38 = vmul.f32 %v1254_v13, %v876_v41  ;;  %v2460_v61 = vadd.f32 1e-06, %v551_v10  ;;  %vm2483_vm7 = vmor %vm881_vm1, %vm882_vm4 }
 0x180   : > { %v996_v30 = vadd.f32 %v1924_v32, %v961_v34  ;;  %v830_v63 = vmul.f32 %v2396_v62, %v829_v6  ;;  %v809_v54 = vsub.f32 1.5, %v808_v9  ;;  %v1256_v33 = vpop.eup %1255  ;;  %v549_v11 = vmul.f32 %v2383_v26, %v1648_v15 }
 0x181   : > { %v1003_v1 = vadd.f32 %v1924_v32, %v968_v49  ;;  %v552_v2 = vmul.f32 %v520_v43, %v1648_v15  ;;  %v878_v39 = vmul.f32 0.5, %v877_v38  ;;  %v856_v37 = vmul.f32 %v1256_v33, %v2421_v48 }
 0x182   : > { %1028 = vst.msk [vmem:[%s1957_s9 + $0x98] sm:$0xff] %vm225_vm0, %v996_v30  ;;  %v834_v56 = vsel %vm833_vm5, %v2396_v62, %v830_v63  ;;  %v810_v12 = vmul.f32 %v1252_v24, %v809_v54  ;;  %1259 = vrsqrt.f32 %v2460_v61  ;;  %v2476_v60 = vadd.f32 1e-06, %v549_v11 }
 0x183   : > { %1035 = vst.msk [vmem:[%s1957_s9 + $0xd0] sm:$0xff] %vm225_vm0, %v1003_v1  ;;  %v929_v35 = vmul.f32 %v834_v56, %v1824_v45  ;;  %v879_v15 = vsub.f32 1.5, %v878_v39  ;;  %v857_v17 = vmul.f32 %v1256_v33, %v856_v37  ;;  %v2487_v8 = vadd.f32 1e-06, %v552_v2 }
 0x184   : > { %v814_v26 = vsel %vm813_vm6, %v1252_v24, %v810_v12  ;;  %vm861_vm8 = vweird.f32 %v2421_v48  ;;  %vm862_vm9 = vweird.f32 %v1256_v33  ;;  %1261 = vrsqrt.f32 %v2476_v60 }
 0x185   : > { %v1258_v62 = vpop.eup %1257  ;;  %v966_v27 = vmul.f32 %v1907_v20, %v929_v35  ;;  %v927_v16 = vmul.f32 %v814_v26, %v1808_v22  ;;  %v880_v53 = vmul.f32 %v1254_v13, %v879_v15  ;;  %v858_v23 = vmul.f32 0.5, %v857_v17  ;;  %vm863_vm10 = vmor %vm861_vm8, %vm862_vm9  ;;  %v1266_v15 = vld [vmem:[%s2579_s2] ss:$0 sm:$0xff] }
 0x186   : > { %v836_v18 = vmul.f32 %v1258_v62, %v2445_v44  ;;  %1263 = vrsqrt.f32 %v2487_v8  ;;  %vm842_vm11 = vweird.f32 %v1258_v62  ;;  %vm841_vm12 = vweird.f32 %v2445_v44 }
 0x187   : > { %v1001_v3 = vadd.f32 %v1924_v32, %v966_v27  ;;  %v964_v22 = vmul.f32 %v1907_v20, %v927_v16  ;;  %v884_v50 = vsel %vm2483_vm7, %v1254_v13, %v880_v53  ;;  %v859_v10 = vsub.f32 1.5, %v858_v23  ;;  %vm843_vm13 = vmor %vm841_vm12, %vm842_vm11 }
 0x188   : > { %v837_v24 = vmul.f32 %v1258_v62, %v836_v18  ;;  %v1260_v25 = vpop.eup %1259  ;;  %v934_v59 = vmul.f32 %v884_v50, %v1842_v36  ;;  %vm891_vm14 = vweird.f32 %v2460_v61  ;;  %vm871_vm4 = vweird.f32 %v2476_v60 }
 0x189   : > { %1033 = vst.msk [vmem:[%s1957_s9 + $0xc0] sm:$0xff] %vm225_vm0, %v1001_v3  ;;  %v999_v57 = vadd.f32 %v1924_v32, %v964_v22  ;;  %v860_v51 = vmul.f32 %v1256_v33, %v859_v10  ;;  %v886_v42 = vmul.f32 %v1260_v25, %v2460_v61  ;;  %vm892_vm15 = vweird.f32 %v1260_v25 }
 0x18a   : > { %v838_v21 = vmul.f32 0.5, %v837_v24  ;;  %v971_v7 = vmul.f32 %v1907_v20, %v934_v59  ;;  %v1262_v28 = vpop.eup %1261  ;;  %vm893_vm1 = vmor %vm891_vm14, %vm892_vm15  ;;  %vm901_vm6 = vweird.f32 %v2487_v8 }
 0x18b   : > { %1031 = vst.msk [vmem:[%s1957_s9 + $0xb0] sm:$0xff] %vm225_vm0, %v999_v57  ;;  %v864_v4 = vsel %vm863_vm10, %v1256_v33, %v860_v51  ;;  %v887_v52 = vmul.f32 %v1260_v25, %v886_v42  ;;  %v866_v40 = vmul.f32 %v1262_v28, %v2476_v60  ;;  %vm872_vm2 = vweird.f32 %v1262_v28 }
 0x18c   : > { %v839_v58 = vsub.f32 1.5, %v838_v21  ;;  %v1006_v36 = vadd.f32 %v1924_v32, %v971_v7  ;;  %v932_v19 = vmul.f32 %v864_v4, %v1845_v0  ;;  %v1264_v47 = vpop.eup %1263  ;;  %vm873_vm5 = vmor %vm871_vm4, %vm872_vm2 }
 0x18d   : > { %v888_v13 = vmul.f32 0.5, %v887_v52  ;;  %v896_v55 = vmul.f32 %v1264_v47, %v2487_v8  ;;  %v867_v6 = vmul.f32 %v1262_v28, %v866_v40  ;;  %vm902_vm3 = vweird.f32 %v1264_v47 }
 0x18e   : > { %v840_v31 = vmul.f32 %v1258_v62, %v839_v58  ;;  %1038 = vst.msk [vmem:[%s1957_s9 + $0xe8] sm:$0xff] %vm225_vm0, %v1006_v36  ;;  %v969_v48 = vmul.f32 %v1907_v20, %v932_v19  ;;  %vm903_vm7 = vmor %vm901_vm6, %vm902_vm3 }
 0x18f   : > { %v889_v0 = vsub.f32 1.5, %v888_v13  ;;  %v897_v41 = vmul.f32 %v1264_v47, %v896_v55  ;;  %v868_v49 = vmul.f32 0.5, %v867_v6 }
 0x190   : > { %v844_v34 = vsel %vm843_vm13, %v1258_v62, %v840_v31  ;;  %v1004_v44 = vadd.f32 %v1924_v32, %v969_v48 }
 0x191   : > { %v930_v9 = vmul.f32 %v844_v34, %v1829_v46  ;;  %v890_v43 = vmul.f32 %v1260_v25, %v889_v0  ;;  %v898_v63 = vmul.f32 0.5, %v897_v41  ;;  %v869_v38 = vsub.f32 1.5, %v868_v49 }
 0x192   : > { %1036 = vst.msk [vmem:[%s1957_s9 + $0xd8] sm:$0xff] %vm225_vm0, %v1004_v44 }
 0x193   : > { %v967_v30 = vmul.f32 %v1907_v20, %v930_v9  ;;  %v894_v54 = vsel %vm893_vm1, %v1260_v25, %v890_v43  ;;  %v899_v61 = vsub.f32 1.5, %v898_v63  ;;  %v870_v46 = vmul.f32 %v1262_v28, %v869_v38  ;;  %v1265_v20 = vld [vmem:[%s2578_s1] ss:$0 sm:$0xff] }
 0x194   : > { %v935_v1 = vmul.f32 %v894_v54, %v1862_v29 }
 0x195   : > { %v1002_v33 = vadd.f32 %v1924_v32, %v967_v30  ;;  %v900_v2 = vmul.f32 %v1264_v47, %v899_v61  ;;  %v874_v29 = vsel %vm873_vm5, %v1262_v28, %v870_v46 }
 0x196   : > { %v972_v11 = vmul.f32 %v1265_v20, %v935_v1  ;;  %v933_v12 = vmul.f32 %v874_v29, %v1850_v5 }
 0x197   : > { %1034 = vst.msk [vmem:[%s1957_s9 + $0xc8] sm:$0xff] %vm225_vm0, %v1002_v33  ;;  %v904_v39 = vsel %vm903_vm7, %v1264_v47, %v900_v2 }
 0x198   : > { %v1007_v56 = vadd.f32 %v1924_v32, %v972_v11  ;;  %v936_v37 = vmul.f32 %v904_v39, %v1865_v14  ;;  %v970_v35 = vmul.f32 %v1265_v20, %v933_v12 }
 0x19a   : > { %1039 = vst.msk [vmem:[%s1957_s9 + $0xf0] sm:$0xff] %vm225_vm0, %v1007_v56  ;;  %v973_v26 = vmul.f32 %v1265_v20, %v936_v37  ;;  %v1005_v17 = vadd.f32 %v1266_v15, %v970_v35 }
 0x19c   : > { %v1008_v32 = vadd.f32 %v1266_v15, %v973_v26  ;;  %1037 = vst.msk [vmem:[%s1957_s9 + $0xe0] sm:$0xff] %vm225_vm0, %v1005_v17 }
 0x19e   : > { %1040 = vst.msk [vmem:[%s1957_s9 + $0xf8] sm:$0xff] %vm225_vm0, %v1008_v32 }
 0x19f   : > { %1324 = shalt.err (!%p1321_p4)
}
 0x1a0   : > { %s1368_s29 = smov 128   ;;  %s1369_s9 = smov 8  }
 0x1a1   : > { %1148 = dma.vmem_to_hbm [thread:$0]  (%p1440_p11), %s1055_s22, 4096, %s1057_s27, %s1042_s30, %s1368_s29, %s1368_s29, %s1369_s9  }
 0x1a2 PF: > { %s1071_s11 = sand.u32 1, %s1351_s12   ;;  %p2606_p7 = scmp.ge.s32.totalorder %s1363_s15, 2 }
 0x1a3   : > { %s1072_s17 = scalar_lea.sflag [#allocation4], %s1071_s11 }
 0x1a4   : > { %p1155_p5 = pnand %p2606_p7, %p1444_p12 }
 0x1a6   : > { %p1156_p8 = pneg %p1155_p5 }
 0x1a8   : > { %1346 = dma.done.wait (%p1156_p8), %s1072_s17, 4096  }
 0x1a9   : > { %1348 = vsyncadd (%p1156_p8), %s1072_s17, 4294963200  ;;  %p16_p10 = scmp.ge.s32.totalorder %s1415_s18, 4   ;;  %s2607_s12 = smov %s1355_s13 }
 0x1aa   : > { %s2608_s13 = smov %s1359_s14  ;;  %s2609_s14 = smov %s1427_s21 }
 0x1ab   : > { %s2610_s15 = smov %s1415_s18  ;;  %18 = sbr.rel (!%p16_p10) target bundleno = 5 (0x5), region = 77 }
 0x1b0   :  { %1078 = vsyncpa [#allocation3], 1 }
 0x1b1   :  { %1080 = vsyncpa [#allocation3 + $0x1], 1 }
 0x1b2   :  { %1081 = vsyncpa [#allocation4], 1 }
 0x1b3   :  { %1083 = vsyncpa [#allocation4 + $0x1], 1 }

</bundles_post_ra>
